<compile_context>
chip_gen: v5e
topology: v5e:2x2
jax: 0.10.0
libtpu: 0.0.40
codegen_flags: <defaults>
</compile_context>

<pallas_src>
import jax
import jax.numpy as jnp
from jax import lax
from jax.experimental import pallas as pl
from jax.experimental.pallas import tpu as pltpu


def _pairwise_head_kernel(xw_ref, x_j_ref, bias_ref, out_ref):
    """One (TI, TJ) tile of the weighted-Gram contact map, both classes.

    xw_ref:   (1, 2, TI, H)  VMEM  pre-weighted row block: xw[c, i, h] = x[i, h] * Wp[c, h]
                                   (stays resident across the whole j sweep of an i tile)
    x_j_ref:  (1, TJ, H)     VMEM  plain column block of the cropped activations
    bias_ref: (2,)           SMEM  scalar biases
    out_ref:  (1, 2, TI, TJ) VMEM  channel-major output tile (lane-dense stores)
    """
    x_j = x_j_ref[0]                           # (TJ, H)
    dn = (((1,), (1,)), ((), ()))              # contract H against H (no x_j.T materialized)
    for c in range(2):                         # static unroll; both dots reuse x_j
        g = lax.dot_general(xw_ref[0, c], x_j, dn,
                            preferred_element_type=jnp.float32)   # (TI, TJ) f32 accumulate
        out_ref[0, c] = g + bias_ref[c]


# Target for the double-buffered per-step VMEM working set: leaves headroom under the
# 32 MiB scoped default of v6e/v7x; v5e's 16 MiB default is raised via vmem_limit_bytes.
_VMEM_TILE_TARGET = 28 * 1024 * 1024


def _tile_vmem_bytes(ti, tj, H, in_itemsize):
    # double-buffered xw_i + x_j input blocks (input dtype) + double-buffered f32 output block
    return 2 * (2 * ti * H + tj * H) * in_itemsize + 2 * (2 * ti * tj) * 4


def _auto_tiles(B, sp, H, in_itemsize):
    """Pick (tile_i, tile_j): biggest tile that fits VMEM and keeps the grid populated."""
    if sp <= 256:
        # Single full-extent tile (no grid overhead, no padding waste).  On v7x with B == 1
        # and 128 < S' <= 256, explicit tile_i=tile_j=128 may be preferred for dual-TC use.
        return sp, sp
    fitting = [t for t in (512, 384, 256)
               if t <= sp and _tile_vmem_bytes(t, t, H, in_itemsize) <= _VMEM_TILE_TARGET]
    if not fitting:
        return 128, 128
    for t in fitting:                                  # descending tile size
        if B * pl.cdiv(sp, t) ** 2 >= 8:               # >= 8 parallel steps (v7x 2 TCs x depth)
            return t, t
    return fitting[-1], fitting[-1]                    # occupancy-limited: smallest fitting tile


def pairwise_contact_prediction_head(inputs, weight, bias, *, tile_i=None, tile_j=None,
                                     use_bf16=False, channels_last=True):
    """Forward pass of PairwiseContactPredictionHead (targets=None path).

    inputs: (B, S, H) float32
    weight: (2, 2H)   float32  (PyTorch nn.Linear weight layout: [out, in])
    bias:   (2,)      float32
    returns: (B, S-2, S-2, 2) float32 if channels_last (PyTorch contract), else the
             transpose-free channel-major (B, 2, S-2, S-2) map.
    """
    B, S, H = inputs.shape
    assert weight.shape == (2, 2 * H) and bias.shape == (2,)
    assert S >= 3
    sp = S - 2

    # prod half of the linear weight; the diff (Wd) half cancels under symmetrization and
    # is never computed or transferred.
    wp = weight[:, :H].astype(jnp.float32)

    # Pre-weight the i-side activations once (the [:, 1:-1, :] crop folds into this single
    # elementwise pass); the j side uses the plain cropped activations.
    xw = wp[None, :, None, :] * inputs[:, None, 1:-1, :]          # (B, 2, S', H)
    x = inputs[:, 1:-1, :]                                        # (B, S', H)
    if use_bf16:
        # bf16 MXU fast path: halves input DMA and avoids f32 MXU emulation; accumulation
        # stays f32 (preferred_element_type) and the output stays f32.
        xw = xw.astype(jnp.bfloat16)
        x = x.astype(jnp.bfloat16)
    in_itemsize = jnp.dtype(x.dtype).itemsize

    # Tile selection.
    if tile_i is None or tile_j is None:
        ati, atj = _auto_tiles(B, sp, H, in_itemsize)
        ti = ati if tile_i is None else min(tile_i, sp)
        tj = atj if tile_j is None else min(tile_j, sp)
    else:
        ti, tj = min(tile_i, sp), min(tile_j, sp)
    if ti < sp:
        assert ti % 8 == 0, "tile_i must be a multiple of 8 when the i axis is tiled"
    if tj < sp:
        assert tj % 128 == 0, "tile_j must be a multiple of 128 when the j axis is tiled"

    n_i, n_j = pl.cdiv(sp, ti), pl.cdiv(sp, tj)
    grid = (B, n_i, n_j)

    need = _tile_vmem_bytes(ti, tj, H, in_itemsize)
    vmem_limit = int(min(max(need * 3 // 2 + (4 << 20), 32 << 20), 64 << 20))

    # bytes_accessed: xw i-blocks (fetched once per i tile), x_j re-streamed once per i
    # tile, f32 output.  (The optional wrapper transpose is outside this custom call.)
    cost = pl.CostEstimate(
        flops=2 * B * (2 * sp) * sp * H,
        transcendentals=0,
        bytes_accessed=in_itemsize * B * (2 * sp * H + n_i * sp * H) + 4 * B * 2 * sp * sp,
    )

    out = pl.pallas_call(
        _pairwise_head_kernel,
        out_shape=jax.ShapeDtypeStruct((B, 2, sp, sp), jnp.float32),
        grid=grid,
        in_specs=[
            # i-block of the pre-weighted activations: block index constant across the j
            # sweep, so Pallas fetches it once per i tile.
            pl.BlockSpec((1, 2, ti, H), lambda b, i, j: (b, 0, i, 0)),
            pl.BlockSpec((1, tj, H), lambda b, i, j: (b, j, 0)),
            pl.BlockSpec(memory_space=pltpu.MemorySpace.SMEM),
        ],
        out_specs=pl.BlockSpec((1, 2, ti, tj), lambda b, i, j: (b, 0, i, j)),
        compiler_params=pltpu.CompilerParams(
            dimension_semantics=("parallel", "parallel", "parallel"),
            vmem_limit_bytes=vmem_limit),
        cost_estimate=cost,
    )(xw, x, bias.astype(jnp.float32))

    if channels_last:
        # PyTorch forward contract (B, S', S', 2).  NOTE: this XLA transpose re-reads and
        # re-writes the whole map in HBM; downstream consumers should prefer
        # channels_last=False and take the lane-dense channel-major layout directly.
        return jnp.transpose(out, (0, 2, 3, 1))
    return out


def _reference_forward(inputs, weight, bias):
    """Pure-JAX transcription of the PyTorch forward (dropout in eval = identity)."""
    prod = inputs[:, :, None, :] * inputs[:, None, :, :]
    diff = inputs[:, :, None, :] - inputs[:, None, :, :]
    feat = jnp.concatenate([prod, diff], axis=-1)
    pred = feat @ weight.T + bias
    pred = (pred + jnp.swapaxes(pred, 1, 2)) / 2
    return pred[:, 1:-1, 1:-1, :]


if __name__ == "__main__":
    key = jax.random.PRNGKey(0)

    def _make(B, S, H):
        k_x, k_w, k_b = jax.random.split(jax.random.fold_in(key, S * 131 + H), 3)
        inputs = jax.random.normal(k_x, (B, S, H), dtype=jnp.float32)
        weight = jax.random.normal(k_w, (2, 2 * H), dtype=jnp.float32) * (1.0 / jnp.sqrt(2 * H))
        bias = jax.random.normal(k_b, (2,), dtype=jnp.float32) * 0.01
        return inputs, weight, bias

    def _run_case(B, S, H, rtol=1e-4, atol=1e-4, **kw):
        inputs, weight, bias = _make(B, S, H)
        pred = jax.block_until_ready(
            pairwise_contact_prediction_head(inputs, weight, bias, **kw))
        ref = _reference_forward(inputs, weight, bias)
        assert pred.shape == (B, S - 2, S - 2, 2), pred.shape
        assert jnp.allclose(pred, ref, rtol=rtol, atol=atol), \
            f"mismatch vs pure-JAX reference at B={B} S={S} H={H} kw={kw}"

    # Small shape: single full-extent tile.
    _run_case(2, 8, 32)
    # Explicit 128 tiles, evenly divisible S'.
    _run_case(1, 258, 128, tile_i=128, tile_j=128)
    # Ragged final tile (exercises partial-block clipping on stores).
    _run_case(1, 200, 96, tile_i=128, tile_j=128)
    # Auto tile selection on a tiled map (S' = 388 -> 384 tiles, heavily ragged edge).
    _run_case(2, 390, 64)
    # bf16 MXU fast path (f32 accumulate): relaxed tolerance vs the f32 reference.
    _run_case(1, 258, 128, tile_i=128, tile_j=128, use_bf16=True, rtol=5e-2, atol=6e-2)

    # Channel-major output path (no wrapper transpose of the map).
    inputs, weight, bias = _make(1, 130, 64)
    out_cm = jax.block_until_ready(
        pairwise_contact_prediction_head(inputs, weight, bias, channels_last=False))
    ref_cm = jnp.moveaxis(_reference_forward(inputs, weight, bias), 3, 1)
    assert out_cm.shape == (1, 2, 128, 128), out_cm.shape
    assert jnp.allclose(out_cm, ref_cm, rtol=1e-4, atol=1e-4), \
        "mismatch vs pure-JAX reference (channel-major path)"

    print("KERNEL_OK")
</pallas_src>

<mosaic_0001>
module attributes {stable_mosaic.version = 11 : i64} {
  func.func @_pairwise_head_kernel(%arg0: i32, %arg1: i32, %arg2: i32, %arg3: memref<1x2x6x32xf32, #tpu.memory_space<vmem>>, %arg4: memref<1x6x32xf32, #tpu.memory_space<vmem>>, %arg5: memref<2xf32, #tpu.memory_space<smem>>, %arg6: memref<1x2x6x6xf32, #tpu.memory_space<vmem>>) attributes {dimension_semantics = [#tpu.dimension_semantics<parallel>, #tpu.dimension_semantics<parallel>, #tpu.dimension_semantics<parallel>], iteration_bounds = array<i64: 2, 1, 1>, scalar_prefetch = 0 : i64, scratch_operands = 0 : i64, tpu.core_type = #tpu.core_type<tc>, window_params = [{transform_indices = @transform_0, window_bounds = array<i64: 1, 2, 6, 32>}, {transform_indices = @transform_1, window_bounds = array<i64: 1, 6, 32>}, {transform_indices = @transform_2, window_bounds = array<i64: 2>}, {transform_indices = @transform_3, window_bounds = array<i64: 1, 2, 6, 6>}]} {
    %c0 = arith.constant 0 : index
    %c0_0 = arith.constant 0 : index
    %c0_1 = arith.constant 0 : index
    %0 = vector.load %arg4[%c0, %c0_0, %c0_1] : memref<1x6x32xf32, #tpu.memory_space<vmem>>, vector<1x6x32xf32>
    %1 = vector.shape_cast %0 : vector<1x6x32xf32> to vector<6x32xf32>
    %c0_2 = arith.constant 0 : index
    %c0_3 = arith.constant 0 : index
    %c0_4 = arith.constant 0 : index
    %c0_5 = arith.constant 0 : index
    %2 = vector.load %arg3[%c0_2, %c0_3, %c0_4, %c0_5] : memref<1x2x6x32xf32, #tpu.memory_space<vmem>>, vector<1x1x6x32xf32>
    %3 = vector.shape_cast %2 : vector<1x1x6x32xf32> to vector<6x32xf32>
    %cst = arith.constant dense<0.000000e+00> : vector<6x6xf32>
    %4 = tpu.matmul %3, %1, %cst {dimension_numbers = #tpu.dot_dimension_numbers<[1], [1], [0], [0], [0, 0, 1, 0], [], []>} : vector<6x32xf32>, vector<6x32xf32>, vector<6x6xf32> -> vector<6x6xf32>
    %c0_6 = arith.constant 0 : index
    %5 = memref.load %arg5[%c0_6] : memref<2xf32, #tpu.memory_space<smem>>
    %6 = vector.broadcast %5 : f32 to vector<6x6xf32>
    %7 = arith.addf %4, %6 : vector<6x6xf32>
    %c0_7 = arith.constant 0 : index
    %c0_8 = arith.constant 0 : index
    %c0_9 = arith.constant 0 : index
    %c0_10 = arith.constant 0 : index
    %8 = vector.load %arg6[%c0_7, %c0_8, %c0_9, %c0_10] : memref<1x2x6x6xf32, #tpu.memory_space<vmem>>, vector<1x1x6x6xf32>
    %9 = vector.shape_cast %8 : vector<1x1x6x6xf32> to vector<6x6xf32>
    %10 = vector.shape_cast %7 : vector<6x6xf32> to vector<1x1x6x6xf32>
    tpu.vector_store %arg6[%c0_7, %c0_8, %c0_9, %c0_10], %10 {strides = array<i32>} : memref<1x2x6x6xf32, #tpu.memory_space<vmem>>, vector<1x1x6x6xf32>,
    %c0_11 = arith.constant 0 : index
    %c1 = arith.constant 1 : index
    %c0_12 = arith.constant 0 : index
    %c0_13 = arith.constant 0 : index
    %11 = vector.load %arg3[%c0_11, %c1, %c0_12, %c0_13] : memref<1x2x6x32xf32, #tpu.memory_space<vmem>>, vector<1x1x6x32xf32>
    %12 = vector.shape_cast %11 : vector<1x1x6x32xf32> to vector<6x32xf32>
    %cst_14 = arith.constant dense<0.000000e+00> : vector<6x6xf32>
    %13 = tpu.matmul %12, %1, %cst_14 {dimension_numbers = #tpu.dot_dimension_numbers<[1], [1], [0], [0], [0, 0, 1, 0], [], []>} : vector<6x32xf32>, vector<6x32xf32>, vector<6x6xf32> -> vector<6x6xf32>
    %c1_15 = arith.constant 1 : index
    %14 = memref.load %arg5[%c1_15] : memref<2xf32, #tpu.memory_space<smem>>
    %15 = vector.broadcast %14 : f32 to vector<6x6xf32>
    %16 = arith.addf %13, %15 : vector<6x6xf32>
    %c0_16 = arith.constant 0 : index
    %c1_17 = arith.constant 1 : index
    %c0_18 = arith.constant 0 : index
    %c0_19 = arith.constant 0 : index
    %17 = vector.load %arg6[%c0_16, %c1_17, %c0_18, %c0_19] : memref<1x2x6x6xf32, #tpu.memory_space<vmem>>, vector<1x1x6x6xf32>
    %18 = vector.shape_cast %17 : vector<1x1x6x6xf32> to vector<6x6xf32>
    %19 = vector.shape_cast %16 : vector<6x6xf32> to vector<1x1x6x6xf32>
    tpu.vector_store %arg6[%c0_16, %c1_17, %c0_18, %c0_19], %19 {strides = array<i32>} : memref<1x2x6x6xf32, #tpu.memory_space<vmem>>, vector<1x1x6x6xf32>,
    return
  }
  func.func @transform_0(%arg0: i32, %arg1: i32, %arg2: i32) -> (i32, i32, i32, i32) {
    %c0_i32 = arith.constant 0 : i32
    %c0_i32_0 = arith.constant 0 : i32
    %c0_i32_1 = arith.constant 0 : i32
    return %arg0, %c0_i32, %arg1, %c0_i32_0 : i32, i32, i32, i32
  }
  func.func @transform_1(%arg0: i32, %arg1: i32, %arg2: i32) -> (i32, i32, i32) {
    %c0_i32 = arith.constant 0 : i32
    %c0_i32_0 = arith.constant 0 : i32
    return %arg0, %arg2, %c0_i32 : i32, i32, i32
  }
  func.func @transform_2(%arg0: i32, %arg1: i32, %arg2: i32) -> i32 {
    %c0_i32 = arith.constant 0 : i32
    %c0_i32_0 = arith.constant 0 : i32
    return %c0_i32 : i32
  }
  func.func @transform_3(%arg0: i32, %arg1: i32, %arg2: i32) -> (i32, i32, i32, i32) {
    %c0_i32 = arith.constant 0 : i32
    %c0_i32_0 = arith.constant 0 : i32
    return %arg0, %c0_i32, %arg1, %arg2 : i32, i32, i32, i32
  }
}

</mosaic_0001>

<bundles_post_ra>
// kernel: tpu_custom_call.1
= control target key start
LH: loop header
LB: loop body
LE: loop exit
PB: predicated region body
PF: predicated region fallthrough
CT: control target
= control target key end

     0   :  { %8 = vsyncpa [#allocation3], 0  ;;  %s567_s12 = smov 0   ;;  %s569_s13 = smov 0   ;;  %s607_s0 = inlined_call_operand.vmem [shape: f32[2,2,6,32], index: 0, kind: input, shape index: {}]   ;;  %s608_s1 = inlined_call_operand.vmem [shape: f32[2,6,32], index: 1, kind: input, shape index: {}]   ;;  %s609_s2 = inlined_call_operand.vmem [shape: f32[2], index: 2, kind: input, shape index: {}]   ;;  %s610_s3 = inlined_call_operand.vmem [shape: f32[2,2,6,6], index: 3, kind: output, shape index: {}]  }
   0x1   :  { %s571_s14 = smov 0  }
   0x2 LB: > { %s445_s15 = sadd.s32 4294967295, %s544_s14   ;;  %s33_s16 = sadd.s32 1, %s540_s13  ;;  %s544_s14 = sphi %s571_s14, %s14_s14   ;;  %s540_s13 = sphi %s569_s13, %s612_s13   ;;  %s536_s12 = sphi %s567_s12, %s611_s12  }
   0x3   : > { %p35_p0 = scmp.ge.s32.totalorder %s33_s16, 2  ;;  %p447_p1 = scmp.ge.s32.totalorder %s544_s14, 1 }
   0x4   : > { %p145_p2 = scmp.lt.s32.totalorder %s544_s14, 3  ;;  %p476_p4 = scmp.eq.s32.totalorder %s445_s15, 0 }
   0x5   : > { %s614_s16 = smov (%p35_p0, %s33_s16), 0  ;;  %s157_s19 = sshll.u32 %s609_s2, 4  ;;  %s158_s19 = int_to_ptr.vmem [resolvable:$true] %s157_s19 }
   0x6   : > { %p146_p3 = pnand %p447_p1, %p145_p2  ;;  %s546_s20 = smov [#allocation2]  }
   0x8   : > { %p472_p5 = pneg %p146_p3  ;;  %191 = sbr.rel (%p146_p3) target bundleno = 155 (0x9b), region = 32 }
   0xa   : > { %p473_p6 = pnand %p476_p4, %p472_p5 }
   0xc   : > { %475 = dma.vmem_to_smem (!%p473_p6), %s158_s19, 16, %s546_s20, [#allocation3]  }
   0xd   : > { %531 = dma.done.wait (%p476_p4), [#allocation3], 16  }
   0xe   : > { %533 = vsyncadd (%p476_p4), [#allocation3], 4294967280 }
   0xf   : > { %198 = sfence }
  0x10   : > { %p233_p7 = scmp.lt.s32.totalorder %s536_s12, 1  ;;  %vm263_vm0 = vcmask 261120   ;;  %s261_s29 = sld [smem:[#allocation2]]  ;;  %vm290_vm1 = vcmask 46080  }
  0x11   : > { %s460_s30 = sld [smem:[#allocation2 + $0x1]] }
  0x12   : > { %s616_s12 = smov (!%p233_p7, %s536_s12), 1 }
  0x13   : > { %s454_s21 = sshll.u32 %s616_s12, 3  ;;  %s466_s22 = sshll.u32 %s616_s12, 4 }
  0x14   : > { %s247_s25 = scalar_lea.vmem %s608_s1, %s454_s21  ;;  %s240_s28 = scalar_lea.vmem %s607_s0, %s466_s22 }
  0x15   : > { %v259_v0 = vld [vmem:[%s247_s25] sm:$0x3f]  ;;  %v459_v2 = vld [vmem:[%s240_s28 + $0x8] sm:$0x3f]  ;;  %s258_s6 = scalar_lea.vmem %s610_s3, %s466_s22 }
  0x16   : > { %457 = vmatpush.xpose.msk.msra.mxu0 %vm263_vm0, %v259_v0  ;;  %461 = vmatpush.xpose.msk.msra.mxu1 %vm263_vm0, %v259_v0  ;;  %v260_v1 = vld [vmem:[%s240_s28] sm:$0x3f]  ;;  %v262_v3 = vstv %s261_s29 }
  0x17   : > { %v295_v4 = vstv %s460_s30 }
  0x19   : > { %458 = vmatmul.msk.f32.vlgmr.msra.gmra.mxu0 %vm263_vm0, %v260_v1  ;;  %462 = vmatmul.msk.f32.vlgmr.msra.gmra.mxu1 %vm263_vm0, %v459_v2 }
  0x96   : > { %v287_v5 = vpop.f32.mrf.mxu0  ;;  %v316_v6 = vpop.f32.mrf.mxu1 }
  0x97   : > { %v288_v7 = vadd.f32 %v287_v5, %v262_v3  ;;  %v317_v8 = vadd.f32 %v316_v6, %v295_v4 }
  0x99   : > { %291 = vst.msk [vmem:[%s258_s6] sm:$0x3f] %vm290_vm1, %v288_v7 }
  0x9a   : > { %463 = vst.msk [vmem:[%s258_s6 + $0x8] sm:$0x3f] %vm290_vm1, %v317_v8 }
  0x9b PF: > { %s14_s14 = sadd.s32 1, %s544_s14   ;;  %s611_s12 = smov %s540_s13 }
  0x9c   : > { %p11_p8 = scmp.ge.s32.totalorder %s14_s14, 4   ;;  %s612_s13 = smov %s614_s16 }
  0x9e   :  { %13 = sbr.rel (!%p11_p8) target bundleno = 2 (0x2), region = 72 }
  0xa3   :  { %354 = vsyncpa [#allocation3], 1 }
  0xa4   :  { %356 = vsyncpa [#allocation3 + $0x1], 1 }

</bundles_post_ra>
